<compile_context>
chip_gen: v7x
topology: tpu7x:2x2x1
jax: 0.10.0
libtpu: 0.0.40
codegen_flags: <defaults>
</compile_context>

<pallas_src>
import jax
import jax.numpy as jnp
from jax.experimental import pallas as pl
from jax.experimental.pallas import tpu as pltpu


# ----------------------------- config (mirrors cfg) -----------------------------
N_CHANNELS = 4
IMG_SIZE = 16
VAE_MID_DIM = 32
EMBEDDING_DIM = 8            # must be < 12 per the module's assert
BATCH = 2

INPUT_DIM = N_CHANNELS * IMG_SIZE * IMG_SIZE   # 4*16*16 = 1024
SUBLANE = 8                                    # f32 sublane count (pad batch to this)


# ------------------------------- Pallas kernel ----------------------------------
def aesigmoid_kernel(x_ref,
                     w1_ref, b1_ref,
                     w23_ref, b23_ref,
                     w4_ref, b4_ref,
                     out_ref):
    """Fused encode+decode with fc2/fc3 folded into one 32x32 weight:
       h1  = relu(x @ W1 + b1)                (Bp, mid)   bf16 MXU, f32 acc
       h3  = relu(h1 @ (W2@W3) + (b2@W3+b3))  (Bp, mid)   tiny 32x32, f32
       out = sigmoid(h3 @ W4 + b4)            (Bp, 1024)  bf16 MXU, f32 acc
    """
    # Layer 1: bf16 inputs (cast at the pallas_call boundary), f32 accumulation.
    h1 = jnp.dot(x_ref[...], w1_ref[...], preferred_element_type=jnp.float32)
    h1 = jnp.maximum(h1 + b1_ref[...], 0.0)

    # Fused fc2+fc3 (no nonlinearity between them in the original module).
    h3 = jnp.dot(h1, w23_ref[...], preferred_element_type=jnp.float32)
    h3 = jnp.maximum(h3 + b23_ref[...], 0.0)

    # Layer 4: bf16 operands to the MXU, f32 accumulation; sigmoid in f32.
    logits = jnp.dot(h3.astype(jnp.bfloat16), w4_ref[...],
                     preferred_element_type=jnp.float32)
    out_ref[...] = jax.nn.sigmoid(logits + b4_ref[...]).astype(out_ref.dtype)


def aesigmoid_forward(x_nchw, params):
    """x_nchw: (B, C, H, W) float32. Returns (B, C, H, W) float32."""
    B = x_nchw.shape[0]
    x_flat = x_nchw.reshape(B, INPUT_DIM)          # row-major flatten == torch .view

    # Pad batch to a full f32 sublane so all vregs / stores are unmasked.
    pad = (-B) % SUBLANE
    if pad:
        x_flat = jnp.pad(x_flat, ((0, pad), (0, 0)))
    b_pad = B + pad

    # Algebraic fusion of fc2/fc3 (done once in the wrapper, f32).
    w23 = params["w2"] @ params["w3"]                      # (mid, mid)
    b23 = params["b2"] @ params["w3"] + params["b3"]       # (1, mid)

    # bf16 operands for the two big matmuls; biases stay f32.
    x_bf = x_flat.astype(jnp.bfloat16)
    w1_bf = params["w1"].astype(jnp.bfloat16)
    w4_bf = params["w4"].astype(jnp.bfloat16)

    vmem = pl.BlockSpec(memory_space=pltpu.MemorySpace.VMEM)
    n_inputs = 7  # x, w1, b1, w23, b23, w4, b4

    out_flat = pl.pallas_call(
        aesigmoid_kernel,
        out_shape=jax.ShapeDtypeStruct((b_pad, INPUT_DIM), jnp.float32),
        in_specs=[vmem] * n_inputs,
        out_specs=vmem,
    )(
        x_bf,
        w1_bf, params["b1"],
        w23, b23,
        w4_bf, params["b4"],
    )
    return out_flat[:B].reshape(B, N_CHANNELS, IMG_SIZE, IMG_SIZE)


# -------------------------- deterministic parameter init ------------------------
def init_params(key):
    """Deterministic init mimicking nn.Linear's uniform(-1/sqrt(fan_in), +1/sqrt(fan_in)).
       Weights stored as (in_features, out_features); biases as (1, out_features)."""
    dims = [
        ("w1", "b1", INPUT_DIM, VAE_MID_DIM),
        ("w2", "b2", VAE_MID_DIM, EMBEDDING_DIM),
        ("w3", "b3", EMBEDDING_DIM, VAE_MID_DIM),
        ("w4", "b4", VAE_MID_DIM, INPUT_DIM),
    ]
    params = {}
    keys = jax.random.split(key, 2 * len(dims))
    for i, (wn, bn, fan_in, fan_out) in enumerate(dims):
        bound = 1.0 / jnp.sqrt(jnp.float32(fan_in))
        params[wn] = jax.random.uniform(
            keys[2 * i], (fan_in, fan_out), jnp.float32, -bound, bound)
        params[bn] = jax.random.uniform(
            keys[2 * i + 1], (1, fan_out), jnp.float32, -bound, bound)
    return params


# ------------------------------- plain-JAX reference -----------------------------
def reference_forward(x_nchw, params):
    """Full-precision f32 reference matching the original (unfused) module."""
    x = x_nchw.reshape(x_nchw.shape[0], INPUT_DIM)
    h1 = jax.nn.relu(x @ params["w1"] + params["b1"])
    z = h1 @ params["w2"] + params["b2"]
    h3 = jax.nn.relu(z @ params["w3"] + params["b3"])
    xr = jax.nn.sigmoid(h3 @ params["w4"] + params["b4"])
    return xr.reshape(-1, N_CHANNELS, IMG_SIZE, IMG_SIZE)


if __name__ == "__main__":
    key = jax.random.PRNGKey(0)
    k_x, k_p = jax.random.split(key)

    x = jax.random.normal(k_x, (BATCH, N_CHANNELS, IMG_SIZE, IMG_SIZE), jnp.float32)
    params = init_params(k_p)

    out = aesigmoid_forward(x, params)
    out = jax.block_until_ready(out)

    ref = reference_forward(x, params)
    assert out.shape == (BATCH, N_CHANNELS, IMG_SIZE, IMG_SIZE)
    # Tolerance loosened vs. the f32 reference to account for bf16 MXU operands
    # and the reassociated (fused) fc2/fc3 accumulation.
    assert jnp.allclose(out, ref, atol=2e-2, rtol=2e-2), (
        float(jnp.max(jnp.abs(out - ref))))

    print("KERNEL_OK")
</pallas_src>

<mosaic_0001>
module attributes {stable_mosaic.version = 11 : i64} {
  func.func @aesigmoid_kernel(%arg0: memref<8x1024xbf16, #tpu.memory_space<vmem>>, %arg1: memref<1024x32xbf16, #tpu.memory_space<vmem>>, %arg2: memref<1x32xf32, #tpu.memory_space<vmem>>, %arg3: memref<32x32xf32, #tpu.memory_space<vmem>>, %arg4: memref<1x32xf32, #tpu.memory_space<vmem>>, %arg5: memref<32x1024xbf16, #tpu.memory_space<vmem>>, %arg6: memref<1x1024xf32, #tpu.memory_space<vmem>>, %arg7: memref<8x1024xf32, #tpu.memory_space<vmem>>) attributes {dimension_semantics = [], scalar_prefetch = 0 : i64, scratch_operands = 0 : i64, tpu.core_type = #tpu.core_type<tc>} {
    %c0 = arith.constant 0 : index
    %c0_0 = arith.constant 0 : index
    %0 = vector.load %arg0[%c0, %c0_0] : memref<8x1024xbf16, #tpu.memory_space<vmem>>, vector<8x1024xbf16>
    %c0_1 = arith.constant 0 : index
    %c0_2 = arith.constant 0 : index
    %1 = vector.load %arg1[%c0_1, %c0_2] : memref<1024x32xbf16, #tpu.memory_space<vmem>>, vector<1024x32xbf16>
    %cst = arith.constant dense<0.000000e+00> : vector<8x32xf32>
    %2 = tpu.matmul %0, %1, %cst {dimension_numbers = #tpu.dot_dimension_numbers<[1], [0], [0], [1], [0, 0, 1, 1], [], []>} : vector<8x1024xbf16>, vector<1024x32xbf16>, vector<8x32xf32> -> vector<8x32xf32>
    %c0_3 = arith.constant 0 : index
    %c0_4 = arith.constant 0 : index
    %3 = vector.load %arg2[%c0_3, %c0_4] : memref<1x32xf32, #tpu.memory_space<vmem>>, vector<1x32xf32>
    %4 = vector.broadcast %3 : vector<1x32xf32> to vector<8x32xf32>
    %5 = arith.addf %2, %4 : vector<8x32xf32>
    %cst_5 = arith.constant 0.000000e+00 : f32
    %6 = vector.broadcast %cst_5 : f32 to vector<8x32xf32>
    %7 = arith.maximumf %5, %6 : vector<8x32xf32>
    %c0_6 = arith.constant 0 : index
    %c0_7 = arith.constant 0 : index
    %8 = vector.load %arg3[%c0_6, %c0_7] : memref<32x32xf32, #tpu.memory_space<vmem>>, vector<32x32xf32>
    %cst_8 = arith.constant dense<0.000000e+00> : vector<8x32xf32>
    %9 = tpu.matmul %7, %8, %cst_8 {dimension_numbers = #tpu.dot_dimension_numbers<[1], [0], [0], [1], [0, 0, 1, 1], [], []>} : vector<8x32xf32>, vector<32x32xf32>, vector<8x32xf32> -> vector<8x32xf32>
    %c0_9 = arith.constant 0 : index
    %c0_10 = arith.constant 0 : index
    %10 = vector.load %arg4[%c0_9, %c0_10] : memref<1x32xf32, #tpu.memory_space<vmem>>, vector<1x32xf32>
    %11 = vector.broadcast %10 : vector<1x32xf32> to vector<8x32xf32>
    %12 = arith.addf %9, %11 : vector<8x32xf32>
    %cst_11 = arith.constant 0.000000e+00 : f32
    %13 = vector.broadcast %cst_11 : f32 to vector<8x32xf32>
    %14 = arith.maximumf %12, %13 : vector<8x32xf32>
    %15 = arith.truncf %14 : vector<8x32xf32> to vector<8x32xbf16>
    %c0_12 = arith.constant 0 : index
    %c0_13 = arith.constant 0 : index
    %16 = vector.load %arg5[%c0_12, %c0_13] : memref<32x1024xbf16, #tpu.memory_space<vmem>>, vector<32x1024xbf16>
    %cst_14 = arith.constant dense<0.000000e+00> : vector<8x1024xf32>
    %17 = tpu.matmul %15, %16, %cst_14 {dimension_numbers = #tpu.dot_dimension_numbers<[1], [0], [0], [1], [0, 0, 1, 1], [], []>} : vector<8x32xbf16>, vector<32x1024xbf16>, vector<8x1024xf32> -> vector<8x1024xf32>
    %c0_15 = arith.constant 0 : index
    %c0_16 = arith.constant 0 : index
    %18 = vector.load %arg6[%c0_15, %c0_16] : memref<1x1024xf32, #tpu.memory_space<vmem>>, vector<1x1024xf32>
    %19 = vector.broadcast %18 : vector<1x1024xf32> to vector<8x1024xf32>
    %20 = arith.addf %17, %19 : vector<8x1024xf32>
    %21 = arith.negf %20 : vector<8x1024xf32>
    %22 = math.exp %21 : vector<8x1024xf32>
    %cst_17 = arith.constant 1.000000e+00 : f32
    %23 = vector.broadcast %cst_17 : f32 to vector<8x1024xf32>
    %24 = arith.addf %23, %22 : vector<8x1024xf32>
    %25 = arith.divf %23, %24 : vector<8x1024xf32>
    %c0_18 = arith.constant 0 : index
    %c0_19 = arith.constant 0 : index
    %26 = vector.load %arg7[%c0_18, %c0_19] : memref<8x1024xf32, #tpu.memory_space<vmem>>, vector<8x1024xf32>
    tpu.vector_store %arg7[%c0_18, %c0_19], %25 {strides = array<i32>} : memref<8x1024xf32, #tpu.memory_space<vmem>>, vector<8x1024xf32>,
    return
  }
}

</mosaic_0001>

<bundles_post_ra>
// kernel: tpu_custom_call.1
= control target key start
LH: loop header
LB: loop body
LE: loop exit
PB: predicated region body
PF: predicated region fallthrough
CT: control target
= control target key end

     0   :  { %s1883_s0 = inlined_call_operand.vmem [shape: bf16[8,1024], index: 0, kind: input, shape index: {}]   ;;  %s1884_s1 = inlined_call_operand.vmem [shape: bf16[1024,32], index: 1, kind: input, shape index: {}]   ;;  %s1885_s2 = inlined_call_operand.vmem [shape: f32[1,32], index: 2, kind: input, shape index: {}]   ;;  %s1886_s3 = inlined_call_operand.vmem [shape: f32[32,32], index: 3, kind: input, shape index: {}]   ;;  %s1887_s4 = inlined_call_operand.vmem [shape: f32[1,32], index: 4, kind: input, shape index: {}]   ;;  %s1888_s5 = inlined_call_operand.vmem [shape: bf16[32,1024], index: 5, kind: input, shape index: {}]   ;;  %s1889_s6 = inlined_call_operand.vmem [shape: f32[1,1024], index: 6, kind: input, shape index: {}]   ;;  %s1890_s7 = inlined_call_operand.hbm [shape: f32[8,1024], index: 7, kind: output, shape index: {}]  }
   0x1   :  { %v1420_v0 = vld [vmem:[%s1884_s1 + $0x40] sm:$0xff]   ;;  %v1424_v4 = vld [vmem:[%s1884_s1 + $0x48] sm:$0xff]   ;;  %v1428_v8 = vld [vmem:[%s1884_s1 + $0x50] sm:$0xff]  }
   0x2   :  { %v1421_v1 = vld [vmem:[%s1884_s1 + $0xc0] sm:$0xff]   ;;  %1305 = vmatprep.subr.bf16.mxu0 %v1420_v0  ;;  %v1425_v5 = vld [vmem:[%s1884_s1 + $0xc8] sm:$0xff]   ;;  %v1429_v9 = vld [vmem:[%s1884_s1 + $0xd0] sm:$0xff]  }
   0x3   :  { %v1422_v2 = vld [vmem:[%s1884_s1] sm:$0xff]   ;;  %1327 = vmatprep.subr.bf16.mxu1 %v1421_v1  ;;  %v1426_v6 = vld [vmem:[%s1884_s1 + $0x8] sm:$0xff]   ;;  %v1430_v10 = vld [vmem:[%s1884_s1 + $0x10] sm:$0xff]  }
   0x4   :  { %v1423_v3 = vld [vmem:[%s1884_s1 + $0x80] sm:$0xff]   ;;  %1306 = vmatpush3.bf16.msra.mxu0 %v1422_v2  ;;  %v1427_v7 = vld [vmem:[%s1884_s1 + $0x88] sm:$0xff]   ;;  %v1431_v11 = vld [vmem:[%s1884_s1 + $0x90] sm:$0xff]  }
   0x5   :  { %1328 = vmatpush3.bf16.msra.mxu1 %v1423_v3  ;;  %1307 = vmatprep.subr.bf16.mxu0 %v1424_v4  ;;  %v1432_v12 = vld [vmem:[%s1884_s1 + $0x58] sm:$0xff]   ;;  %v1436_v16 = vld [vmem:[%s1884_s1 + $0x60] sm:$0xff]   ;;  %v1440_v20 = vld [vmem:[%s1884_s1 + $0x68] sm:$0xff]  }
   0x6   :  { %1329 = vmatprep.subr.bf16.mxu1 %v1425_v5  ;;  %v1433_v13 = vld [vmem:[%s1884_s1 + $0xd8] sm:$0xff]   ;;  %v1437_v17 = vld [vmem:[%s1884_s1 + $0xe0] sm:$0xff]   ;;  %v1441_v21 = vld [vmem:[%s1884_s1 + $0xe8] sm:$0xff]  }
   0x7   :  { %v1434_v14 = vld [vmem:[%s1884_s1 + $0x18] sm:$0xff]   ;;  %v1438_v18 = vld [vmem:[%s1884_s1 + $0x20] sm:$0xff]   ;;  %v1442_v22 = vld [vmem:[%s1884_s1 + $0x28] sm:$0xff]  }
   0x8   :  { %1308 = vmatpush3.bf16.msra.mxu0 %v1426_v6  ;;  %v1435_v15 = vld [vmem:[%s1884_s1 + $0x98] sm:$0xff]   ;;  %v1439_v19 = vld [vmem:[%s1884_s1 + $0xa0] sm:$0xff]   ;;  %v1443_v23 = vld [vmem:[%s1884_s1 + $0xa8] sm:$0xff]  }
   0x9   :  { %1330 = vmatpush3.bf16.msra.mxu1 %v1427_v7  ;;  %1309 = vmatprep.subr.bf16.mxu0 %v1428_v8  ;;  %v1444_v24 = vld [vmem:[%s1884_s1 + $0x70] sm:$0xff]   ;;  %v1448_v28 = vld [vmem:[%s1884_s1 + $0x78] sm:$0xff]   ;;  %v28_v32 = vld [vmem:[%s1883_s0] sm:$0xff] }
   0xa   :  { %1331 = vmatprep.subr.bf16.mxu1 %v1429_v9  ;;  %v1445_v25 = vld [vmem:[%s1884_s1 + $0xf0] sm:$0xff]   ;;  %v1449_v29 = vld [vmem:[%s1884_s1 + $0xf8] sm:$0xff]   ;;  %v29_v33 = vld [vmem:[%s1883_s0 + $0x8] sm:$0xff]  ;;  %v1203_v34 = vcombine.low %v28_v32, %v28_v32  ;;  %v1204_v35 = vcombine.high %v28_v32, %v28_v32 }
   0xb   :  { %v1446_v26 = vld [vmem:[%s1884_s1 + $0x30] sm:$0xff]   ;;  %v1450_v30 = vld [vmem:[%s1884_s1 + $0x38] sm:$0xff]   ;;  %v1205_v36 = vcombine.low %v29_v33, %v29_v33  ;;  %v1206_v37 = vcombine.high %v29_v33, %v29_v33  ;;  %v1456_v38 = vld [vmem:[%s1884_s1 + $0x140] sm:$0xff]  }
   0xc   :  { %1310 = vmatpush3.bf16.msra.mxu0 %v1430_v10  ;;  %v1447_v27 = vld [vmem:[%s1884_s1 + $0xb0] sm:$0xff]   ;;  %v1451_v31 = vld [vmem:[%s1884_s1 + $0xb8] sm:$0xff]   ;;  %v1457_v39 = vld [vmem:[%s1884_s1 + $0x1c0] sm:$0xff]   ;;  %611 = vmatprep.mubr.bf16.mxu0 %v1204_v35 }
   0xd   :  { %1332 = vmatpush3.bf16.msra.mxu1 %v1431_v11  ;;  %1311 = vmatprep.subr.bf16.mxu0 %v1432_v12  ;;  %v1458_v40 = vld [vmem:[%s1884_s1 + $0x100] sm:$0xff]   ;;  %v1460_v42 = vld [vmem:[%s1884_s1 + $0x148] sm:$0xff]   ;;  %v1464_v46 = vld [vmem:[%s1884_s1 + $0x150] sm:$0xff]  }
   0xe   :  { %1333 = vmatprep.subr.bf16.mxu1 %v1433_v13  ;;  %651 = vmatprep.mubr.bf16.mxu1 %v1206_v37  ;;  %v1459_v41 = vld [vmem:[%s1884_s1 + $0x180] sm:$0xff]   ;;  %v1461_v43 = vld [vmem:[%s1884_s1 + $0x1c8] sm:$0xff]   ;;  %v1465_v47 = vld [vmem:[%s1884_s1 + $0x1d0] sm:$0xff]  }
   0xf   :  { %v1462_v44 = vld [vmem:[%s1884_s1 + $0x108] sm:$0xff]   ;;  %v1466_v48 = vld [vmem:[%s1884_s1 + $0x110] sm:$0xff]   ;;  %v1468_v50 = vld [vmem:[%s1884_s1 + $0x158] sm:$0xff]  }
  0x10   :  { %1312 = vmatpush3.bf16.msra.mxu0 %v1434_v14  ;;  %v1463_v45 = vld [vmem:[%s1884_s1 + $0x188] sm:$0xff]   ;;  %v1467_v49 = vld [vmem:[%s1884_s1 + $0x190] sm:$0xff]   ;;  %v1469_v51 = vld [vmem:[%s1884_s1 + $0x1d8] sm:$0xff]  }
  0x11   :  { %1334 = vmatpush3.bf16.msra.mxu1 %v1435_v15  ;;  %1313 = vmatprep.subr.bf16.mxu0 %v1436_v16  ;;  %v1470_v52 = vld [vmem:[%s1884_s1 + $0x118] sm:$0xff]   ;;  %v1472_v54 = vld [vmem:[%s1884_s1 + $0x160] sm:$0xff]   ;;  %v1476_v58 = vld [vmem:[%s1884_s1 + $0x168] sm:$0xff]  }
  0x12   :  { %1335 = vmatprep.subr.bf16.mxu1 %v1437_v17  ;;  %v1471_v53 = vld [vmem:[%s1884_s1 + $0x198] sm:$0xff]   ;;  %v1473_v55 = vld [vmem:[%s1884_s1 + $0x1e0] sm:$0xff]   ;;  %v1477_v59 = vld [vmem:[%s1884_s1 + $0x1e8] sm:$0xff]  }
  0x13   :  { %v1474_v56 = vld [vmem:[%s1884_s1 + $0x120] sm:$0xff]   ;;  %v1478_v60 = vld [vmem:[%s1884_s1 + $0x128] sm:$0xff]   ;;  %v1480_v62 = vld [vmem:[%s1884_s1 + $0x170] sm:$0xff]  }
  0x14   :  { %1314 = vmatpush3.bf16.msra.mxu0 %v1438_v18  ;;  %v1475_v57 = vld [vmem:[%s1884_s1 + $0x1a0] sm:$0xff]   ;;  %v1479_v61 = vld [vmem:[%s1884_s1 + $0x1a8] sm:$0xff]   ;;  %v1481_v63 = vld [vmem:[%s1884_s1 + $0x1f0] sm:$0xff]  }
  0x15   :  { %1336 = vmatpush3.bf16.msra.mxu1 %v1439_v19  ;;  %1315 = vmatprep.subr.bf16.mxu0 %v1440_v20  ;;  %v1482_v0 = vld [vmem:[%s1884_s1 + $0x130] sm:$0xff]   ;;  %v1484_v2 = vld [vmem:[%s1884_s1 + $0x178] sm:$0xff]  }
  0x16   :  { %1337 = vmatprep.subr.bf16.mxu1 %v1441_v21  ;;  %v1483_v1 = vld [vmem:[%s1884_s1 + $0x1b0] sm:$0xff]   ;;  %v1485_v3 = vld [vmem:[%s1884_s1 + $0x1f8] sm:$0xff]  }
  0x17   :  { %v1486_v4 = vld [vmem:[%s1884_s1 + $0x138] sm:$0xff]   ;;  %v30_v6 = vld [vmem:[%s1883_s0 + $0x10] sm:$0xff] }
  0x18   :  { %1316 = vmatpush3.bf16.msra.mxu0 %v1442_v22  ;;  %v1487_v5 = vld [vmem:[%s1884_s1 + $0x1b8] sm:$0xff]   ;;  %v1207_v7 = vcombine.low %v30_v6, %v30_v6  ;;  %v1208_v8 = vcombine.high %v30_v6, %v30_v6 }
  0x19   :  { %1338 = vmatpush3.bf16.msra.mxu1 %v1443_v23  ;;  %1317 = vmatprep.subr.bf16.mxu0 %v1444_v24  ;;  %v31_v9 = vld [vmem:[%s1883_s0 + $0x18] sm:$0xff] }
  0x1a   :  { %1339 = vmatprep.subr.bf16.mxu1 %v1445_v25 }
  0x1c   :  { %1318 = vmatpush3.bf16.msra.mxu0 %v1446_v26 }
  0x1d   :  { %1340 = vmatpush3.bf16.msra.mxu1 %v1447_v27  ;;  %1319 = vmatprep.subr.bf16.mxu0 %v1448_v28 }
  0x1e   :  { %1341 = vmatprep.subr.bf16.mxu1 %v1449_v29 }
  0x20   :  { %1320 = vmatpush3.bf16.msra.mxu0 %v1450_v30 }
  0x21   :  { %1342 = vmatpush3.bf16.msra.mxu1 %v1451_v31  ;;  %1349 = vmatprep.subr.bf16.mxu0 %v1456_v38 }
  0x22   :  { %1371 = vmatprep.subr.bf16.mxu1 %v1457_v39 }
  0x23   :  { %612 = vmatmul.mubr.bf16.vlgmr.msra.gmra.mrb[0].mxu0 %v1203_v34 }
  0x24   :  { %652 = vmatmul.mubr.bf16.vlgmr.msra.gmra.mrb[0].mxu1 %v1205_v36  ;;  %1350 = vmatpush3.bf16.msra.mxu0 %v1458_v40 }
  0x25   :  { %1372 = vmatpush3.bf16.msra.mxu1 %v1459_v41  ;;  %1351 = vmatprep.subr.bf16.mxu0 %v1460_v42 }
  0x26   :  { %1373 = vmatprep.subr.bf16.mxu1 %v1461_v43 }
  0x28   :  { %1352 = vmatpush3.bf16.msra.mxu0 %v1462_v44 }
  0x29   :  { %1374 = vmatpush3.bf16.msra.mxu1 %v1463_v45  ;;  %1353 = vmatprep.subr.bf16.mxu0 %v1464_v46 }
  0x2a   :  { %1375 = vmatprep.subr.bf16.mxu1 %v1465_v47 }
  0x2c   :  { %1354 = vmatpush3.bf16.msra.mxu0 %v1466_v48 }
  0x2d   :  { %1376 = vmatpush3.bf16.msra.mxu1 %v1467_v49  ;;  %1355 = vmatprep.subr.bf16.mxu0 %v1468_v50 }
  0x2e   :  { %1377 = vmatprep.subr.bf16.mxu1 %v1469_v51 }
  0x30   :  { %1356 = vmatpush3.bf16.msra.mxu0 %v1470_v52 }
  0x31   :  { %1378 = vmatpush3.bf16.msra.mxu1 %v1471_v53  ;;  %1357 = vmatprep.subr.bf16.mxu0 %v1472_v54 }
  0x32   :  { %1379 = vmatprep.subr.bf16.mxu1 %v1473_v55 }
  0x34   :  { %1358 = vmatpush3.bf16.msra.mxu0 %v1474_v56 }
  0x35   :  { %1380 = vmatpush3.bf16.msra.mxu1 %v1475_v57  ;;  %1359 = vmatprep.subr.bf16.mxu0 %v1476_v58 }
  0x36   :  { %1381 = vmatprep.subr.bf16.mxu1 %v1477_v59 }
  0x38   :  { %1360 = vmatpush3.bf16.msra.mxu0 %v1478_v60 }
  0x39   :  { %1382 = vmatpush3.bf16.msra.mxu1 %v1479_v61  ;;  %1361 = vmatprep.subr.bf16.mxu0 %v1480_v62 }
  0x3a   :  { %1383 = vmatprep.subr.bf16.mxu1 %v1481_v63 }
  0x3c   :  { %1362 = vmatpush3.bf16.msra.mxu0 %v1482_v0 }
  0x3d   :  { %1384 = vmatpush3.bf16.msra.mxu1 %v1483_v1  ;;  %1363 = vmatprep.subr.bf16.mxu0 %v1484_v2 }
  0x3e   :  { %1385 = vmatprep.subr.bf16.mxu1 %v1485_v3 }
  0x3f   :  { %12 = vsyncpa [#allocation3], 0  ;;  %v1209_v10 = vcombine.low %v31_v9, %v31_v9  ;;  %v1210_v11 = vcombine.high %v31_v9, %v31_v9  ;;  %691 = vmatprep.mubr.bf16.mxu0 %v1208_v8  ;;  %v740_v12 = vld [vmem:[%s1886_s3] sm:$0xff]  ;;  %v741_v13 = vld [vmem:[%s1886_s3 + $0x8] sm:$0xff]  ;;  %v1548_v15 = vmov 0.0|0.0   ;;  %vm1549_vm0 = vmmov 0  }
  0x40   :  { %1364 = vmatpush3.bf16.msra.mxu0 %v1486_v4  ;;  %v1410_v14 = vpack.c.bf16 %v741_v13, %v740_v12  ;;  %v742_v16 = vld [vmem:[%s1886_s3 + $0x10] sm:$0xff]  ;;  %v743_v17 = vld [vmem:[%s1886_s3 + $0x18] sm:$0xff]  ;;  %v1550_v19 = vmov 0.0   ;;  %v827_v20 = vld [vmem:[%s1888_s5] sm:$0xff]  ;;  %vm751_vm1 = vcmask 261120   ;;  %v1551_v4 = vmov 0  }
  0x41   :  { %1386 = vmatpush3.bf16.msra.mxu1 %v1487_v5  ;;  %731 = vmatprep.mubr.bf16.mxu1 %v1210_v11  ;;  %v1413_v18 = vpack.c.bf16 %v743_v17, %v742_v16  ;;  %v831_v21 = vld [vmem:[%s1888_s5 + $0x20] sm:$0xff]  ;;  %v828_v22 = vld [vmem:[%s1888_s5 + $0x8] sm:$0xff]  ;;  %v829_v62 = vld [vmem:[%s1888_s5 + $0x10] sm:$0xff] }
  0x42   :  { %1409 = vmatprep.subr.bf16.mxu0 %v1548_v15  ;;  %v1277_v23 = vcombine.low %v827_v20, %v831_v21  ;;  %v1278_v24 = vcombine.high %v827_v20, %v831_v21  ;;  %v832_v25 = vld [vmem:[%s1888_s5 + $0x28] sm:$0xff]  ;;  %v1202_v30 = vld [vmem:[%s1885_s2] ss:$0 sm:$0xff]  ;;  %v833_v63 = vld [vmem:[%s1888_s5 + $0x30] sm:$0xff]  ;;  %v845_v21 = vlaneseq }
  0x43   :  { %692 = vmatmul.mubr.bf16.vlgmr.msra.gmra.mrb[4].mxu0 %v1207_v7  ;;  %v1279_v26 = vcombine.low %v828_v22, %v832_v25  ;;  %v1280_v27 = vcombine.high %v828_v22, %v832_v25  ;;  %v835_v54 = vld [vmem:[%s1888_s5 + $0x40] sm:$0xff]  ;;  %v836_v56 = vld [vmem:[%s1888_s5 + $0x48] sm:$0xff]  ;;  %v830_v0 = vld [vmem:[%s1888_s5 + $0x18] sm:$0xff]  ;;  %v1281_v1 = vcombine.low %v829_v62, %v833_v63  ;;  %v1282_v2 = vcombine.high %v829_v62, %v833_v63 }
  0x44   :  { %732 = vmatmul.mubr.bf16.vlgmr.msra.gmra.mrb[4].mxu1 %v1209_v10  ;;  %1411 = vmatpush3.bf16.msra.mxu0 %v1410_v14  ;;  %v839_v55 = vld [vmem:[%s1888_s5 + $0x60] sm:$0xff]  ;;  %v840_v58 = vld [vmem:[%s1888_s5 + $0x68] sm:$0xff]  ;;  %v834_v3 = vld [vmem:[%s1888_s5 + $0x38] sm:$0xff]  ;;  %v846_v22 = vshrl.u32 %v845_v21, 7 }
  0x45   :  { %1412 = vmatprep.subr.bf16.mxu0 %v1548_v15  ;;  %1406 = vmatprep.mubr.msk.f32.mxu0 %vm1549_vm0, %v1550_v19  ;;  %v1286_v57 = vcombine.high %v835_v54, %v839_v55  ;;  %v1285_v59 = vcombine.low %v835_v54, %v839_v55  ;;  %v1287_v60 = vcombine.low %v836_v56, %v840_v58  ;;  %v1275_v7 = vld [vmem:[%s1887_s4] ss:$0 sm:$0xff]  ;;  %v837_v11 = vld [vmem:[%s1888_s5 + $0x50] sm:$0xff]  ;;  %v838_v13 = vld [vmem:[%s1888_s5 + $0x58] sm:$0xff] }
  0x46   :  { %968 = vmatprep.subr.bf16.mxu1 %v1278_v24  ;;  %v1288_v61 = vcombine.high %v836_v56, %v840_v58  ;;  %1000 = vmatprep.mubr.bf16.mxu1 %v1551_v4  ;;  %v1283_v5 = vcombine.low %v830_v0, %v834_v3  ;;  %v1284_v6 = vcombine.high %v830_v0, %v834_v3  ;;  %v841_v12 = vld [vmem:[%s1888_s5 + $0x70] sm:$0xff]  ;;  %v842_v14 = vld [vmem:[%s1888_s5 + $0x78] sm:$0xff]  ;;  %v855_v24 = vsub.s32 2, %v846_v22  ;;  %v843_v25 = vld [vmem:[%s1889_s6] sm:$0xff]  ;;  %s1552_s6 = smov [#allocation2]  }
  0x47   :  { %969 = vmatpush1.bf16.msra.mxu1 %v1277_v23  ;;  %v1290_v17 = vcombine.high %v837_v11, %v841_v12  ;;  %v1289_v19 = vcombine.low %v837_v11, %v841_v12  ;;  %v1291_v20 = vcombine.low %v838_v13, %v842_v14  ;;  %v847_v23 = vsub.s32 0, %v846_v22  ;;  %s1194_s13 = sshll.u32 %s1552_s6, 4  ;;  %s1195_s13 = int_to_ptr.vmem [resolvable:$true] %s1194_s13 }
  0x48   :  { %1414 = vmatpush3.bf16.msra.mxu0 %v1413_v18  ;;  %970 = vmatprep.subr.bf16.mxu1 %v1286_v57  ;;  %v1292_v18 = vcombine.high %v838_v13, %v842_v14  ;;  %s1524_s2 = scalar_lea.vmem %s1195_s13, 1024  ;;  %p1529_p1 = scmp.lt.s32.totalorder %s1195_s13, %s1195_s13 }
  0x49   :  { %1009 = vmatprep.subr.bf16.mxu0 %v1280_v27  ;;  %v859_v27 = vsub.s32 3, %v846_v22  ;;  %p1525_p0 = scmp.ne.s32.totalorder %s1195_s13, %s1524_s2  ;;  %p1530_p2 = scmp.lt.s32.totalorder %s1524_s2, %s1524_s2 }
  0x4b   :  { %971 = vmatpush1.bf16.msra.mxu1 %v1285_v59  ;;  %p1531_p3 = por %p1530_p2, %p1529_p1 }
  0x4c   :  { %1050 = vmatprep.subr.bf16.mxu1 %v1282_v2 }
  0x4d   :  { %p1532_p4 = pnand %p1531_p3, %p1525_p0 }
  0xf6   :  { %v1321_v28 = vpop.f32.mrb[0].mxu0 }
  0xf7   :  { %v1343_v29 = vpop.f32.mrb[0].mxu1  ;;  %v1322_v31 = vpop.f32.mrb[1].mxu0 }
  0xf8   :  { %v1344_v32 = vpop.f32.mrb[1].mxu1  ;;  %v1323_v33 = vadd.f32 %v1322_v31, %v1321_v28  ;;  %v1324_v35 = vpop.f32.mrb[2].mxu0  ;;  %v848_v28 = vrot.slane %v843_v25, %v847_v23  ;;  %v860_v31 = vrot.slane %v843_v25, %v859_v27 }
  0xf9   :  { %v1345_v34 = vadd.f32 %v1344_v32, %v1343_v29  ;;  %v1346_v36 = vpop.f32.mrb[2].mxu1  ;;  %v1325_v37 = vpop.f32.mrb[3].mxu0  ;;  %v856_v29 = vrot.slane %v843_v25, %v855_v24 }
  0xfa   :  { %v1347_v38 = vpop.f32.mrb[3].mxu1  ;;  %v614_v39 = vadd.f32 %v1323_v33, %v1202_v30 }
  0xfb   :  { %v863_v38 = vsub.s32 4, %v846_v22 }
  0xfc   :  { %v654_v40 = vadd.f32 %v1345_v34, %v614_v39  ;;  %v871_v39 = vsub.s32 6, %v846_v22 }
 0x116   :  { %v1365_v41 = vpop.f32.mrb[4].mxu0 }
 0x117   :  { %v1387_v42 = vpop.f32.mrb[4].mxu1  ;;  %v1366_v43 = vpop.f32.mrb[5].mxu0 }
 0x118   :  { %v1388_v44 = vpop.f32.mrb[5].mxu1  ;;  %v1367_v45 = vadd.f32 %v1366_v43, %v1365_v41  ;;  %v1368_v47 = vpop.f32.mrb[6].mxu0 }
 0x119   :  { %v1389_v46 = vadd.f32 %v1388_v44, %v1387_v42  ;;  %v1390_v48 = vpop.f32.mrb[6].mxu1  ;;  %v1369_v49 = vpop.f32.mrb[7].mxu0  ;;  %v867_v44 = vsub.s32 5, %v846_v22 }
 0x11a   :  { %v1391_v50 = vpop.f32.mrb[7].mxu1  ;;  %v694_v51 = vadd.f32 %v1367_v45, %v654_v40  ;;  %v875_v45 = vsub.s32 7, %v846_v22 }
 0x11b   :  { %v868_v54 = vrot.slane %v843_v25, %v867_v44 }
 0x11c   :  { %v734_v52 = vadd.f32 %v1389_v46, %v694_v51  ;;  %v876_v55 = vrot.slane %v843_v25, %v875_v45 }
 0x11e   :  { %v739_v53 = vmax.f32 %v734_v52, 0.0  ;;  %v864_v52 = vrot.slane %v843_v25, %v863_v38 }
 0x120   :  { %1407 = vmatmul.mubr.msk.f32.vlgmr.msra.gmra.mrb[8].mxu0 %vm751_vm1, %v739_v53  ;;  %v872_v53 = vrot.slane %v843_v25, %v871_v39 }
 0x121   :  { %1010 = vmatpush1.bf16.msra.mxu0 %v1279_v26  ;;  %1041 = vmatprep.mubr.bf16.mxu0 %v1551_v4  ;;  %v851_v26 = vsub.s32 1, %v846_v22 }
 0x122   :  { %1011 = vmatprep.subr.bf16.mxu0 %v1288_v61 }
 0x123   :  { %v852_v30 = vrot.slane %v843_v25, %v851_v26 }
 0x125   :  { %1012 = vmatpush1.bf16.msra.mxu0 %v1287_v60 }
 0x126   :  { %1091 = vmatprep.subr.bf16.mxu0 %v1284_v6 }
 0x1f3   :  { %v821_v8 = vpop.f32.mrb[8].mxu0 }
 0x1f4   :  { %v822_v9 = vadd.f32 %v1275_v7, %v821_v8  ;;  %v1408_v10 = vpop.f32.mrb[9].mxu0 }
 0x1f6   :  { %v825_v15 = vmax.f32 %v822_v9, 0.0 }
 0x1f8   :  { %v826_v16 = vpack.c.bf16 %v825_v15, %v825_v15 }
 0x1fa   :  { %1293 = vmatmul.mubr.msk.bf16.vlgmr.msra.gmra.mrb[8].mxu1 %vm751_vm1, %v826_v16  ;;  %1294 = vmatmul.mubr.msk.bf16.vlgmr.msra.gmra.mrb[12].mxu0 %vm751_vm1, %v826_v16 }
 0x1fb   :  { %1051 = vmatpush1.bf16.msra.mxu1 %v1281_v1  ;;  %1092 = vmatpush1.bf16.msra.mxu0 %v1283_v5 }
 0x1fc   :  { %1052 = vmatprep.subr.bf16.mxu1 %v1290_v17  ;;  %1093 = vmatprep.subr.bf16.mxu0 %v1292_v18 }
 0x1fd   :  { %1082 = vmatprep.mubr.bf16.mxu1 %v1551_v4  ;;  %1123 = vmatprep.mubr.bf16.mxu0 %v1551_v4 }
 0x1ff   :  { %1053 = vmatpush1.bf16.msra.mxu1 %v1289_v19  ;;  %1094 = vmatpush1.bf16.msra.mxu0 %v1291_v20 }
 0x202   :  { %1295 = vmatmul.mubr.msk.bf16.vlgmr.msra.gmra.mrb[12].mxu1 %vm751_vm1, %v826_v16  ;;  %1296 = vmatmul.mubr.msk.bf16.vlgmr.msra.gmra.mrb[16].mxu0 %vm751_vm1, %v826_v16 }
 0x2cd   :  { %v1002_v32 = vpop.f32.mrb[8].mxu1  ;;  %v1043_v33 = vpop.f32.mrb[12].mxu0 }
 0x2ce   :  { %v1003_v34 = vadd.f32 %v1002_v32, %v848_v28  ;;  %v1044_v35 = vadd.f32 %v1043_v33, %v856_v29  ;;  %v1004_v36 = vpop.f32.mrb[9].mxu1  ;;  %v1045_v37 = vpop.f32.mrb[13].mxu0 }
 0x2cf   :  { %v1005_v40 = vadd.f32 %v1004_v36, %v852_v30  ;;  %v1046_v41 = vadd.f32 %v1045_v37, %v860_v31  ;;  %v1006_v42 = vpop.f32.mrb[10].mxu1  ;;  %v1047_v43 = vpop.f32.mrb[14].mxu0 }
 0x2d0   :  { %v1297_v46 = vmul.f32 -1.442695, %v1003_v34  ;;  %v1299_v47 = vmul.f32 -1.442695, %v1044_v35  ;;  %v1007_v48 = vpop.f32.mrb[11].mxu1  ;;  %v1048_v49 = vpop.f32.mrb[15].mxu0 }
 0x2d1   :  { %v1298_v50 = vmul.f32 -1.442695, %v1005_v40  ;;  %v1300_v51 = vmul.f32 -1.442695, %v1046_v41 }
 0x2d2   :  { %1492 = vpow2.f32 %v1297_v46 }
 0x2d3   :  { %1494 = vpow2.f32 %v1299_v47 }
 0x2d4   :  { %1496 = vpow2.f32 %v1298_v50 }
 0x2d5   :  { %1498 = vpow2.f32 %v1300_v51  ;;  %v1084_v56 = vpop.f32.mrb[12].mxu1  ;;  %v1125_v57 = vpop.f32.mrb[16].mxu0 }
 0x2d6   :  { %v1085_v58 = vadd.f32 %v1084_v56, %v864_v52  ;;  %v1126_v59 = vadd.f32 %v1125_v57, %v872_v53  ;;  %v1086_v60 = vpop.f32.mrb[13].mxu1  ;;  %v1127_v61 = vpop.f32.mrb[17].mxu0 }
 0x2d7   :  { %v1087_v62 = vadd.f32 %v1086_v60, %v868_v54  ;;  %v1128_v63 = vadd.f32 %v1127_v61, %v876_v55  ;;  %v1088_v0 = vpop.f32.mrb[14].mxu1  ;;  %v1129_v1 = vpop.f32.mrb[18].mxu0 }
 0x2d8   :  { %v1301_v2 = vmul.f32 -1.442695, %v1085_v58  ;;  %v1303_v3 = vmul.f32 -1.442695, %v1126_v59  ;;  %v1089_v4 = vpop.f32.mrb[15].mxu1  ;;  %v1130_v5 = vpop.f32.mrb[19].mxu0 }
 0x2d9   :  { %v1302_v6 = vmul.f32 -1.442695, %v1087_v62  ;;  %v1304_v7 = vmul.f32 -1.442695, %v1128_v63 }
 0x2da   :  { %1500 = vpow2.f32 %v1301_v2 }
 0x2db   :  { %1502 = vpow2.f32 %v1303_v3 }
 0x2dc   :  { %v1493_v8 = vpop.eup %1492  ;;  %1504 = vpow2.f32 %v1302_v6 }
 0x2dd   :  { %v1495_v9 = vpop.eup %1494  ;;  %v1156_v10 = vadd.f32 1.0, %v1493_v8  ;;  %1506 = vpow2.f32 %v1304_v7 }
 0x2de   :  { %v1497_v11 = vpop.eup %1496  ;;  %v1158_v12 = vadd.f32 1.0, %v1495_v9 }
 0x2df   :  { %v1499_v13 = vpop.eup %1498  ;;  %1508 = vrcp.f32 %v1156_v10  ;;  %v1157_v14 = vadd.f32 1.0, %v1497_v11 }
 0x2e0   :  { %1510 = vrcp.f32 %v1158_v12  ;;  %v1159_v15 = vadd.f32 1.0, %v1499_v13 }
 0x2e1   :  { %1512 = vrcp.f32 %v1157_v14 }
 0x2e2   :  { %1514 = vrcp.f32 %v1159_v15 }
 0x2e4   :  { %v1501_v16 = vpop.eup %1500 }
 0x2e5   :  { %v1503_v17 = vpop.eup %1502  ;;  %v1160_v18 = vadd.f32 1.0, %v1501_v16 }
 0x2e6   :  { %v1505_v19 = vpop.eup %1504  ;;  %v1162_v20 = vadd.f32 1.0, %v1503_v17 }
 0x2e7   :  { %v1507_v21 = vpop.eup %1506  ;;  %1516 = vrcp.f32 %v1160_v18  ;;  %v1161_v22 = vadd.f32 1.0, %v1505_v19 }
 0x2e8   :  { %1518 = vrcp.f32 %v1162_v20  ;;  %v1163_v23 = vadd.f32 1.0, %v1507_v21 }
 0x2e9   :  { %v1509_v24 = vpop.eup %1508  ;;  %1520 = vrcp.f32 %v1161_v22 }
 0x2ea   :  { %v1511_v25 = vpop.eup %1510  ;;  %1180 = vst [vmem:[#allocation2] sm:$0xff] %v1509_v24  ;;  %1522 = vrcp.f32 %v1163_v23 }
 0x2eb   :  { %v1513_v26 = vpop.eup %1512  ;;  %1182 = vst [vmem:[#allocation2 + $0x10] sm:$0xff] %v1511_v25 }
 0x2ec   :  { %v1515_v27 = vpop.eup %1514  ;;  %1181 = vst [vmem:[#allocation2 + $0x8] sm:$0xff] %v1513_v26 }
 0x2ed   :  { %1183 = vst [vmem:[#allocation2 + $0x18] sm:$0xff] %v1515_v27 }
 0x2f1   :  { %v1517_v28 = vpop.eup %1516 }
 0x2f2   :  { %v1519_v29 = vpop.eup %1518  ;;  %1184 = vst [vmem:[#allocation2 + $0x20] sm:$0xff] %v1517_v28 }
 0x2f3   :  { %v1521_v30 = vpop.eup %1520  ;;  %1186 = vst [vmem:[#allocation2 + $0x30] sm:$0xff] %v1519_v29 }
 0x2f4   :  { %v1523_v31 = vpop.eup %1522  ;;  %1185 = vst [vmem:[#allocation2 + $0x28] sm:$0xff] %v1521_v30 }
 0x2f5   :  { %1187 = vst [vmem:[#allocation2 + $0x38] sm:$0xff] %v1523_v31 }
 0x2f6   :  { %1535 = shalt.err (!%p1532_p4)
}
 0x2f7   :  { %s1536_s16 = scalar_lea.hbm %s1890_s7, 1024 }
 0x2f8   :  { %p1537_p5 = scmp.ne.s32.totalorder %s1890_s7, %s1536_s16  ;;  %p1540_p6 = scmp.lt.u32.totalorder %s1536_s16, %s1890_s7 }
 0x2fa   :  { %p1542_p7 = pnand %p1540_p6, %p1537_p5 }
 0x2fc   :  { %1545 = shalt.err (!%p1542_p7)
}
 0x2fd   :  { %1197 = dma.vmem_to_hbm [thread:$0]  %s1195_s13, 1024, %s1890_s7, [#allocation3]  }
 0x2fe   :  { %1546 = dma.done.wait [#allocation3], 1024  }
 0x2ff   :  { %1547 = vsyncadd [#allocation3], 4294966272 }
 0x300   :  { %1201 = vsyncpa [#allocation3], 1 }

</bundles_post_ra>
